<compile_context>
chip_gen: v7x
topology: tpu7x:2x2x1
jax: 0.10.0
libtpu: 0.0.40
codegen_flags: <defaults>
</compile_context>

<pallas_src>
import jax
import jax.numpy as jnp
from jax.experimental import pallas as pl
from jax.experimental.pallas import tpu as pltpu


def _round_up(x, m):
    return ((x + m - 1) // m) * m


def _mlp_kernel(x_ref, w1_ref, b1_ref, w2_ref, b2_ref, w3_ref, b3_ref,
                o_ref, acc_ref):
    """One (batch-tile, K-tile) grid step.

    K (the fc1 feature-dim reduction) is the last, 'arbitrary' grid axis, so
    the f32 accumulator scratch and the output block stay resident across it.
    """
    k = pl.program_id(1)

    @pl.when(k == 0)
    def _init():
        acc_ref[...] = jnp.zeros_like(acc_ref)

    # fc1 partial product for this K slab (MXU, f32 accumulation).
    acc_ref[...] += jnp.dot(x_ref[...], w1_ref[...],
                            preferred_element_type=jnp.float32)

    @pl.when(k == pl.num_programs(1) - 1)
    def _finish():
        # fc1 bias + ReLU (dropout == identity in eval mode).
        h1 = jnp.maximum(acc_ref[...] + b1_ref[...], 0.0)
        # fc2 (dropout == identity in eval mode).
        h2 = jnp.dot(h1, w2_ref[...], preferred_element_type=jnp.float32)
        h2 = h2 + b2_ref[...]
        # fc3 + sigmoid (transcendental goes to the EUP slot).
        h3 = jnp.dot(h2, w3_ref[...], preferred_element_type=jnp.float32)
        h3 = h3 + b3_ref[...]
        o_ref[...] = jax.nn.sigmoid(h3).astype(o_ref.dtype)


def mlp_forward(x, params, *, tm=512, tk=1024, compute_dtype=None):
    """x: (B, input_dim). params: dict of w1,b1,w2,b2,w3,b3 (weights as (in,out)).

    compute_dtype: optional dtype (e.g. jnp.bfloat16) for the HBM->VMEM stream
    of x and w1; accumulation stays f32.
    """
    B, D = x.shape
    H1 = params["w1"].shape[1]   # 32
    H2 = params["w2"].shape[1]   # 16
    H3 = params["w3"].shape[1]   # 1

    # ---- batch (row) tile: as large as reasonable, but keep >=4 batch grid
    #      steps when the batch allows it (pipelining + v7x dual-TC sharding).
    tm = max(8, min(tm, _round_up(B, 8)))
    tm -= tm % 8
    while tm > 128 and pl.cdiv(B, tm) < 4:
        tm //= 2
        tm -= tm % 8
    B_pad = _round_up(B, tm)

    # ---- K tile over the feature dim so the resident w1 slab is (tk, 32). ----
    if D <= tk:
        tk = D
        D_pad = D
    else:
        tk = max(128, (tk // 128) * 128)
        D_pad = _round_up(D, tk)

    cd = jnp.dtype(compute_dtype) if compute_dtype is not None else jnp.dtype(x.dtype)

    xp = x
    if (B_pad, D_pad) != (B, D):
        xp = jnp.pad(x, ((0, B_pad - B), (0, D_pad - D)))
    w1 = params["w1"]
    if D_pad != D:
        w1 = jnp.pad(w1, ((0, D_pad - D), (0, 0)))

    # Only the bandwidth-dominant operands (x, w1) get the optional narrow
    # dtype; the tiny fc2/fc3 weights and all biases stay f32.
    xp = xp.astype(cd)
    w1 = w1.astype(cd)
    w2 = params["w2"].astype(jnp.float32)
    w3 = params["w3"].astype(jnp.float32)
    b1 = params["b1"].astype(jnp.float32)
    b2 = params["b2"].astype(jnp.float32)
    b3 = params["b3"].astype(jnp.float32)

    grid = (B_pad // tm, D_pad // tk)

    # Rough VMEM budget (lane padding of the 32/16/1-wide operands to 128
    # included).  Raise the scoped limit past v5e's 16 MiB default, but cap it
    # well under v7x's 64 MiB physical VMEM.
    itemsize = cd.itemsize
    est = (2 * tm * tk * itemsize          # x tile, double-buffered
           + 2 * tk * 128 * itemsize       # w1 slab (32 -> 128 lane pad), x2
           + 2 * tm * 128 * 4              # output block (1 -> 128 lane pad), x2
           + tm * 128 * 4                  # f32 accumulator
           + 10 * 128 * 128 * 4)           # small weights / biases + headroom
    vmem_limit = int(min(48 * 2**20, max(32 * 2**20, 2 * est)))

    out = pl.pallas_call(
        _mlp_kernel,
        out_shape=jax.ShapeDtypeStruct((B_pad, H3), jnp.float32),
        grid_spec=pltpu.PrefetchScalarGridSpec(
            num_scalar_prefetch=0,
            grid=grid,
            in_specs=[
                pl.BlockSpec((tm, tk), lambda i, k: (i, k)),    # x (streams)
                pl.BlockSpec((tk, H1), lambda i, k: (k, 0)),    # w1 K slab
                pl.BlockSpec((1, H1), lambda i, k: (0, 0)),     # b1 (resident)
                pl.BlockSpec((H1, H2), lambda i, k: (0, 0)),    # w2 (resident)
                pl.BlockSpec((1, H2), lambda i, k: (0, 0)),     # b2 (resident)
                pl.BlockSpec((H2, H3), lambda i, k: (0, 0)),    # w3 (resident)
                pl.BlockSpec((1, H3), lambda i, k: (0, 0)),     # b3 (resident)
            ],
            out_specs=pl.BlockSpec((tm, H3), lambda i, k: (i, 0)),
            scratch_shapes=[pltpu.VMEM((tm, H1), jnp.float32)],
        ),
        compiler_params=pltpu.CompilerParams(
            dimension_semantics=("parallel", "arbitrary"),
            vmem_limit_bytes=vmem_limit,
        ),
    )(xp, w1, b1, w2, b2, w3, b3)

    return out[:B]


def init_params(key, input_dim):
    """Deterministic init mimicking nn.Linear's uniform(-1/sqrt(fan_in), ...)."""
    ks = jax.random.split(key, 6)

    def lin(kw, kb, fan_in, fan_out):
        bound = 1.0 / jnp.sqrt(fan_in)
        w = jax.random.uniform(kw, (fan_in, fan_out), jnp.float32, -bound, bound)
        b = jax.random.uniform(kb, (1, fan_out), jnp.float32, -bound, bound)
        return w, b

    w1, b1 = lin(ks[0], ks[1], input_dim, 32)
    w2, b2 = lin(ks[2], ks[3], 32, 16)
    w3, b3 = lin(ks[4], ks[5], 16, 1)
    return dict(w1=w1, b1=b1, w2=w2, b2=b2, w3=w3, b3=b3)


def reference_forward(x, p):
    h1 = jnp.maximum(x @ p["w1"] + p["b1"], 0.0)
    h2 = h1 @ p["w2"] + p["b2"]
    h3 = h2 @ p["w3"] + p["b3"]
    return jax.nn.sigmoid(h3)


if __name__ == "__main__":
    key = jax.random.PRNGKey(0)
    k_x1, k_x2, k_p = jax.random.split(key, 3)

    # Config 1: tiny shapes, single tile (sanity check, default tile sizes).
    B1, D1 = 8, 64
    x1 = jax.random.normal(k_x1, (B1, D1), jnp.float32)
    p1 = init_params(k_p, D1)
    o1 = jax.block_until_ready(mlp_forward(x1, p1))
    r1 = reference_forward(x1, p1)
    assert o1.shape == (B1, 1)
    assert jnp.allclose(o1, r1, atol=1e-5, rtol=1e-5), "config1 mismatch vs reference"

    # Config 2: exercises K tiling over the feature dim + batch/feature padding.
    B2, D2 = 24, 300
    x2 = jax.random.normal(k_x2, (B2, D2), jnp.float32)
    p2 = init_params(k_p, D2)
    o2 = jax.block_until_ready(mlp_forward(x2, p2, tm=8, tk=128))
    r2 = reference_forward(x2, p2)
    assert o2.shape == (B2, 1)
    assert jnp.allclose(o2, r2, atol=1e-4, rtol=1e-4), "config2 mismatch vs reference"

    # Config 3: bf16 HBM stream for x / w1 with f32 accumulation.
    o3 = jax.block_until_ready(
        mlp_forward(x2, p2, tm=16, tk=128, compute_dtype=jnp.bfloat16))
    assert o3.shape == (B2, 1)
    assert jnp.allclose(o3, r2, atol=1e-2, rtol=1e-2), "config3 (bf16) mismatch vs reference"

    print("KERNEL_OK")
</pallas_src>

<mosaic_0001>
module attributes {stable_mosaic.version = 11 : i64} {
  func.func @_mlp_kernel(%arg0: i32, %arg1: i32, %arg2: memref<8x64xf32, #tpu.memory_space<vmem>>, %arg3: memref<64x32xf32, #tpu.memory_space<vmem>>, %arg4: memref<1x32xf32, #tpu.memory_space<vmem>>, %arg5: memref<32x16xf32, #tpu.memory_space<vmem>>, %arg6: memref<1x16xf32, #tpu.memory_space<vmem>>, %arg7: memref<16x1xf32, #tpu.memory_space<vmem>>, %arg8: memref<1x1xf32, #tpu.memory_space<vmem>>, %arg9: memref<8x1xf32, #tpu.memory_space<vmem>>, %arg10: memref<8x32xf32, #tpu.memory_space<vmem>>) attributes {dimension_semantics = [#tpu.dimension_semantics<parallel>, #tpu.dimension_semantics<arbitrary>], iteration_bounds = array<i64: 1, 1>, scalar_prefetch = 0 : i64, scratch_operands = 1 : i64, tpu.core_type = #tpu.core_type<tc>, window_params = [{transform_indices = @transform_0, window_bounds = array<i64: 8, 64>}, {transform_indices = @transform_1, window_bounds = array<i64: 64, 32>}, {pipeline_mode = #tpu.pipeline_mode<synchronous>, transform_indices = @transform_2, window_bounds = array<i64: 1, 32>}, {pipeline_mode = #tpu.pipeline_mode<synchronous>, transform_indices = @transform_3, window_bounds = array<i64: 32, 16>}, {pipeline_mode = #tpu.pipeline_mode<synchronous>, transform_indices = @transform_4, window_bounds = array<i64: 1, 16>}, {pipeline_mode = #tpu.pipeline_mode<synchronous>, transform_indices = @transform_5, window_bounds = array<i64: 16, 1>}, {pipeline_mode = #tpu.pipeline_mode<synchronous>, transform_indices = @transform_6, window_bounds = array<i64: 1, 1>}, {transform_indices = @transform_7, window_bounds = array<i64: 8, 1>}]} {
    %c0_i32 = arith.constant 0 : i32
    %0 = arith.cmpi eq, %arg1, %c0_i32 : i32
    %1 = arith.extui %0 : i1 to i32
    %c0_i32_0 = arith.constant 0 : i32
    %2 = arith.cmpi ne, %1, %c0_i32_0 : i32
    scf.if %2 {
      %cst_10 = arith.constant 0.000000e+00 : f32
      %12 = vector.broadcast %cst_10 : f32 to vector<8x32xf32>
      %c0_11 = arith.constant 0 : index
      %c0_12 = arith.constant 0 : index
      %13 = vector.load %arg10[%c0_11, %c0_12] : memref<8x32xf32, #tpu.memory_space<vmem>>, vector<8x32xf32>
      tpu.vector_store %arg10[%c0_11, %c0_12], %12 {strides = array<i32>} : memref<8x32xf32, #tpu.memory_space<vmem>>, vector<8x32xf32>,
    } else {
    }
    %c0 = arith.constant 0 : index
    %c0_1 = arith.constant 0 : index
    %3 = vector.load %arg10[%c0, %c0_1] : memref<8x32xf32, #tpu.memory_space<vmem>>, vector<8x32xf32>
    %c0_2 = arith.constant 0 : index
    %c0_3 = arith.constant 0 : index
    %4 = vector.load %arg2[%c0_2, %c0_3] : memref<8x64xf32, #tpu.memory_space<vmem>>, vector<8x64xf32>
    %c0_4 = arith.constant 0 : index
    %c0_5 = arith.constant 0 : index
    %5 = vector.load %arg3[%c0_4, %c0_5] : memref<64x32xf32, #tpu.memory_space<vmem>>, vector<64x32xf32>
    %cst = arith.constant dense<0.000000e+00> : vector<8x32xf32>
    %6 = tpu.matmul %4, %5, %cst {dimension_numbers = #tpu.dot_dimension_numbers<[1], [0], [0], [1], [0, 0, 1, 1], [], []>} : vector<8x64xf32>, vector<64x32xf32>, vector<8x32xf32> -> vector<8x32xf32>
    %7 = arith.addf %3, %6 : vector<8x32xf32>
    %c0_6 = arith.constant 0 : index
    %c0_7 = arith.constant 0 : index
    %8 = vector.load %arg10[%c0_6, %c0_7] : memref<8x32xf32, #tpu.memory_space<vmem>>, vector<8x32xf32>
    tpu.vector_store %arg10[%c0_6, %c0_7], %7 {strides = array<i32>} : memref<8x32xf32, #tpu.memory_space<vmem>>, vector<8x32xf32>,
    %c0_i32_8 = arith.constant 0 : i32
    %9 = arith.cmpi eq, %arg1, %c0_i32_8 : i32
    %10 = arith.extui %9 : i1 to i32
    %c0_i32_9 = arith.constant 0 : i32
    %11 = arith.cmpi ne, %10, %c0_i32_9 : i32
    scf.if %11 {
      %c0_10 = arith.constant 0 : index
      %c0_11 = arith.constant 0 : index
      %12 = vector.load %arg10[%c0_10, %c0_11] : memref<8x32xf32, #tpu.memory_space<vmem>>, vector<8x32xf32>
      %c0_12 = arith.constant 0 : index
      %c0_13 = arith.constant 0 : index
      %13 = vector.load %arg4[%c0_12, %c0_13] : memref<1x32xf32, #tpu.memory_space<vmem>>, vector<1x32xf32>
      %14 = vector.broadcast %13 : vector<1x32xf32> to vector<8x32xf32>
      %15 = arith.addf %12, %14 : vector<8x32xf32>
      %cst_14 = arith.constant 0.000000e+00 : f32
      %16 = vector.broadcast %cst_14 : f32 to vector<8x32xf32>
      %17 = arith.maximumf %15, %16 : vector<8x32xf32>
      %c0_15 = arith.constant 0 : index
      %c0_16 = arith.constant 0 : index
      %18 = vector.load %arg5[%c0_15, %c0_16] : memref<32x16xf32, #tpu.memory_space<vmem>>, vector<32x16xf32>
      %cst_17 = arith.constant dense<0.000000e+00> : vector<8x16xf32>
      %19 = tpu.matmul %17, %18, %cst_17 {dimension_numbers = #tpu.dot_dimension_numbers<[1], [0], [0], [1], [0, 0, 1, 1], [], []>} : vector<8x32xf32>, vector<32x16xf32>, vector<8x16xf32> -> vector<8x16xf32>
      %c0_18 = arith.constant 0 : index
      %c0_19 = arith.constant 0 : index
      %20 = vector.load %arg6[%c0_18, %c0_19] : memref<1x16xf32, #tpu.memory_space<vmem>>, vector<1x16xf32>
      %21 = vector.broadcast %20 : vector<1x16xf32> to vector<8x16xf32>
      %22 = arith.addf %19, %21 : vector<8x16xf32>
      %c0_20 = arith.constant 0 : index
      %c0_21 = arith.constant 0 : index
      %23 = vector.load %arg7[%c0_20, %c0_21] : memref<16x1xf32, #tpu.memory_space<vmem>>, vector<16x1xf32>
      %cst_22 = arith.constant dense<0.000000e+00> : vector<8x1xf32>
      %24 = tpu.matmul %22, %23, %cst_22 {dimension_numbers = #tpu.dot_dimension_numbers<[1], [0], [0], [1], [0, 0, 1, 1], [], []>} : vector<8x16xf32>, vector<16x1xf32>, vector<8x1xf32> -> vector<8x1xf32>
      %c0_23 = arith.constant 0 : index
      %c0_24 = arith.constant 0 : index
      %25 = vector.load %arg8[%c0_23, %c0_24] : memref<1x1xf32, #tpu.memory_space<vmem>>, vector<1x1xf32>
      %26 = vector.broadcast %25 : vector<1x1xf32> to vector<8x1xf32>
      %27 = arith.addf %24, %26 : vector<8x1xf32>
      %28 = arith.negf %27 : vector<8x1xf32>
      %29 = math.exp %28 : vector<8x1xf32>
      %cst_25 = arith.constant 1.000000e+00 : f32
      %30 = vector.broadcast %cst_25 : f32 to vector<8x1xf32>
      %31 = arith.addf %30, %29 : vector<8x1xf32>
      %32 = arith.divf %30, %31 : vector<8x1xf32>
      %c0_26 = arith.constant 0 : index
      %c0_27 = arith.constant 0 : index
      %33 = vector.load %arg9[%c0_26, %c0_27] : memref<8x1xf32, #tpu.memory_space<vmem>>, vector<8x1xf32>
      tpu.vector_store %arg9[%c0_26, %c0_27], %32 {strides = array<i32>} : memref<8x1xf32, #tpu.memory_space<vmem>>, vector<8x1xf32>,
    } else {
    }
    return
  }
  func.func @transform_0(%arg0: i32, %arg1: i32) -> (i32, i32) {
    %c0_i32 = arith.constant 0 : i32
    return %arg0, %arg1 : i32, i32
  }
  func.func @transform_1(%arg0: i32, %arg1: i32) -> (i32, i32) {
    %c0_i32 = arith.constant 0 : i32
    %c0_i32_0 = arith.constant 0 : i32
    return %arg1, %c0_i32 : i32, i32
  }
  func.func @transform_2(%arg0: i32, %arg1: i32) -> (i32, i32) {
    %c0_i32 = arith.constant 0 : i32
    %c0_i32_0 = arith.constant 0 : i32
    %c0_i32_1 = arith.constant 0 : i32
    return %c0_i32, %c0_i32_0 : i32, i32
  }
  func.func @transform_3(%arg0: i32, %arg1: i32) -> (i32, i32) {
    %c0_i32 = arith.constant 0 : i32
    %c0_i32_0 = arith.constant 0 : i32
    %c0_i32_1 = arith.constant 0 : i32
    return %c0_i32, %c0_i32_0 : i32, i32
  }
  func.func @transform_4(%arg0: i32, %arg1: i32) -> (i32, i32) {
    %c0_i32 = arith.constant 0 : i32
    %c0_i32_0 = arith.constant 0 : i32
    %c0_i32_1 = arith.constant 0 : i32
    return %c0_i32, %c0_i32_0 : i32, i32
  }
  func.func @transform_5(%arg0: i32, %arg1: i32) -> (i32, i32) {
    %c0_i32 = arith.constant 0 : i32
    %c0_i32_0 = arith.constant 0 : i32
    %c0_i32_1 = arith.constant 0 : i32
    return %c0_i32, %c0_i32_0 : i32, i32
  }
  func.func @transform_6(%arg0: i32, %arg1: i32) -> (i32, i32) {
    %c0_i32 = arith.constant 0 : i32
    %c0_i32_0 = arith.constant 0 : i32
    %c0_i32_1 = arith.constant 0 : i32
    return %c0_i32, %c0_i32_0 : i32, i32
  }
  func.func @transform_7(%arg0: i32, %arg1: i32) -> (i32, i32) {
    %c0_i32 = arith.constant 0 : i32
    %c0_i32_0 = arith.constant 0 : i32
    return %arg0, %c0_i32 : i32, i32
  }
}

</mosaic_0001>

<bundles_post_ra>
// kernel: tpu_custom_call.1
= control target key start
LH: loop header
LB: loop body
LE: loop exit
PB: predicated region body
PF: predicated region fallthrough
CT: control target
= control target key end

     0   :  { %v402_v0 = vmov 0.0|0.0   ;;  %vm403_vm0 = vmmov 0   ;;  %v404_v4 = vmov 0.0   ;;  %vm32_vm1 = vcmask 261120   ;;  %s508_s1 = inlined_call_operand.vmem [shape: f32[64,32], index: 1, kind: input, shape index: {}]   ;;  %s509_s0 = inlined_call_operand.vmem [shape: f32[8,64], index: 0, kind: input, shape index: {}]   ;;  %s510_s3 = inlined_call_operand.vmem [shape: f32[32,16], index: 3, kind: input, shape index: {}]   ;;  %s511_s2 = inlined_call_operand.vmem [shape: f32[1,32], index: 2, kind: input, shape index: {}]   ;;  %s512_s5 = inlined_call_operand.vmem [shape: f32[16,1], index: 5, kind: input, shape index: {}]   ;;  %s513_s6 = inlined_call_operand.<no memory space> [shape: f32[1,1], index: 6, kind: input, shape index: {}]   ;;  %s514_s4 = inlined_call_operand.vmem [shape: f32[1,16], index: 4, kind: input, shape index: {}]   ;;  %s515_s7 = inlined_call_operand.vmem [shape: f32[8,1], index: 7, kind: output, shape index: {}]  }
   0x1   :  { %374 = vmatprep.subr.bf16.mxu0 %v402_v0  ;;  %v36_v1 = vld [vmem:[%s508_s1] sm:$0xff]  ;;  %v37_v2 = vld [vmem:[%s508_s1 + $0x8] sm:$0xff]  ;;  %v38_v3 = vld [vmem:[%s508_s1 + $0x10] sm:$0xff]  ;;  %353 = vmatprep.mubr.msk.f32.mxu0 %vm403_vm0, %v404_v4  ;;  %33 = vst.msk [vmem:[#allocation2] sm:$0xff] %vm32_vm1, %v404_v4  ;;  %vm44_vm2 = vcmask 523264   ;;  %v12_v32 = vstv %s513_s6  ;;  %vm227_vm3 = vcmask 130048  }
   0x2   :  { %v375_v5 = vpack.c.bf16 %v37_v2, %v36_v1  ;;  %v39_v6 = vld [vmem:[%s508_s1 + $0x18] sm:$0xff]  ;;  %386 = vmatprep.subr.bf16.mxu1 %v402_v0  ;;  %364 = vmatprep.mubr.msk.f32.mxu1 %vm403_vm0, %v404_v4  ;;  %v40_v8 = vld [vmem:[%s508_s1 + $0x20] sm:$0xff]  ;;  %v41_v9 = vld [vmem:[%s508_s1 + $0x28] sm:$0xff]  ;;  %13 = vst [vmem:[#allocation3] sm:$0x1] %v12_v32  ;;  %vm307_vm4 = vcmask 7168  }
   0x3   :  { %v378_v7 = vpack.c.bf16 %v39_v6, %v38_v3  ;;  %v381_v10 = vpack.c.bf16 %v41_v9, %v40_v8  ;;  %v42_v11 = vld [vmem:[%s508_s1 + $0x30] sm:$0xff]  ;;  %v43_v12 = vld [vmem:[%s508_s1 + $0x38] sm:$0xff]  ;;  %v35_v14 = vld [vmem:[%s509_s0] sm:$0xff] }
   0x4   :  { %376 = vmatpush3.bf16.msra.mxu0 %v375_v5  ;;  %v384_v13 = vpack.c.bf16 %v43_v12, %v42_v11  ;;  %v134_v15 = vld [vmem:[%s510_s3] sm:$0xff]  ;;  %v135_v16 = vld [vmem:[%s510_s3 + $0x8] sm:$0xff]  ;;  %v136_v17 = vld [vmem:[%s510_s3 + $0x10] sm:$0xff] }
   0x5   :  { %377 = vmatprep.subr.bf16.mxu0 %v402_v0  ;;  %v387_v18 = vpack.c.bf16 %v135_v16, %v134_v15  ;;  %v137_v19 = vld [vmem:[%s510_s3 + $0x18] sm:$0xff]  ;;  %v314_v25 = vld [vmem:[%s511_s2] ss:$0 sm:$0xff]  ;;  %v219_v27 = vld [vmem:[%s512_s5 + $0x8] sm:$0xff] }
   0x6   :  { %v390_v20 = vpack.c.bf16 %v137_v19, %v136_v17  ;;  %v218_v26 = vld [vmem:[%s512_s5] sm:$0xff] }
   0x7   :  { %388 = vmatpush3.bf16.msra.mxu1 %v387_v18  ;;  %v393_v30 = vpack.c.bf16 %v219_v27, %v218_v26  ;;  %v315_v33 = vld [vmem:[%s514_s4] ss:$0 sm:$0xff] }
   0x8   :  { %379 = vmatpush3.bf16.msra.mxu0 %v378_v7  ;;  %389 = vmatprep.subr.bf16.mxu1 %v402_v0  ;;  %v34_v21 = vld [vmem:[#allocation2] sm:$0xff] }
   0x9   :  { %380 = vmatprep.subr.bf16.mxu0 %v402_v0  ;;  %v317_v37 = vld [vmem:[#allocation3] ss:$0 sm:$0xff] }
   0xb   :  { %391 = vmatpush3.bf16.msra.mxu1 %v390_v20 }
   0xc   :  { %382 = vmatpush3.bf16.msra.mxu0 %v381_v10  ;;  %392 = vmatprep.subr.bf16.mxu1 %v402_v0 }
   0xd   :  { %383 = vmatprep.subr.bf16.mxu0 %v402_v0 }
  0x10   :  { %385 = vmatpush3.bf16.msra.mxu0 %v384_v13 }
  0x13   :  { %354 = vmatmul.mubr.msk.f32.vlgmr.msra.gmra.mrb[0].mxu0 %vm44_vm2, %v35_v14 }
  0xe6   :  { %v114_v22 = vpop.f32.mrb[0].mxu0 }
  0xe7   :  { %v118_v23 = vadd.f32 %v114_v22, %v34_v21  ;;  %v355_v24 = vpop.f32.mrb[1].mxu0 }
  0xe9   :  { %120 = vst.msk [vmem:[#allocation2] sm:$0xff] %vm32_vm1, %v118_v23 }
  0xf0   :  { %v124_v28 = vld [vmem:[#allocation2] sm:$0xff] }
  0xf1   :  { %v132_v29 = vadd.f32 %v314_v25, %v124_v28 }
  0xf3   :  { %v133_v31 = vmax.f32 %v132_v29, 0.0 }
  0xf5   :  { %365 = vmatmul.mubr.msk.f32.vlgmr.msra.gmra.mrb[0].mxu1 %vm32_vm1, %v133_v31 }
  0xf6   :  { %394 = vmatpush3.bf16.msra.mxu1 %v393_v30  ;;  %371 = vmatprep.mubr.msk.f32.mxu1 %vm403_vm0, %v404_v4 }
 0x1c8   :  { %v214_v34 = vpop.f32.mrb[0].mxu1 }
 0x1c9   :  { %v215_v35 = vadd.f32 %v315_v33, %v214_v34  ;;  %v366_v36 = vpop.f32.mrb[1].mxu1 }
 0x1cb   :  { %372 = vmatmul.mubr.msk.f32.vlgmr.msra.gmra.mrb[2].mxu1 %vm227_vm3, %v215_v35 }
 0x29e   :  { %v297_v38 = vpop.f32.mrb[2].mxu1 }
 0x29f   :  { %v298_v39 = vadd.f32 %v317_v37, %v297_v38  ;;  %v373_v40 = vpop.f32.mrb[3].mxu1 }
 0x2a1   :  { %v319_v41 = vmul.f32 -1.442695, %v298_v39 }
 0x2a3   :  { %398 = vpow2.f32 %v319_v41 }
 0x2ad   :  { %v399_v42 = vpop.eup %398 }
 0x2ae   :  { %v304_v43 = vadd.f32 1.0, %v399_v42 }
 0x2b0   :  { %400 = vrcp.f32 %v304_v43 }
 0x2ba   :  { %v401_v44 = vpop.eup %400 }
 0x2bb   :  { %308 = vst.msk [vmem:[%s515_s7] sm:$0xff] %vm307_vm4, %v401_v44 }

</bundles_post_ra>
